<compile_context>
chip_gen: v7x
topology: tpu7x:2x2x1
jax: 0.10.0
libtpu: 0.0.40
codegen_flags: <defaults>
</compile_context>

<pallas_src>
import jax
import jax.numpy as jnp
from jax.experimental import pallas as pl
from jax.experimental.pallas import tpu as pltpu

BN_EPS = 1e-5
_VMEM_LIMIT_BYTES = 48 * 1024 * 1024  # explicit; leaves headroom under v7x's 64 MiB physical VMEM


def _round_up(a, b):
    return (a + b - 1) // b * b


def _proj_stats_kernel(x_ref, w_ref, y_ref, psum_ref, psumsq_ref):
    # x_ref: (TM, Kp) bf16 patch tile, w_ref: (Kp, Ep) bf16 resident weight.
    # Conv2d(stride=patch) == per-patch linear projection -> MXU, f32 accumulate.
    y = jnp.dot(x_ref[...], w_ref[...], preferred_element_type=jnp.float32)
    y_ref[...] = y
    # Per-channel partial BN statistics, single traversal of y while in VMEM.
    psum_ref[...] = jnp.sum(y, axis=0, keepdims=True)[None]        # (1, 1, Ep)
    psumsq_ref[...] = jnp.sum(y * y, axis=0, keepdims=True)[None]  # (1, 1, Ep)


def _normalize_kernel(y_ref, scale_ref, shift_ref, o_ref):
    # Folded BN affine: o = y * scale + shift  (2 broadcast VPU ops per element).
    o_ref[...] = (y_ref[...] * scale_ref[...] + shift_ref[...]).astype(o_ref.dtype)


def patch_embed_forward(x, weight, bias, gamma, beta, patch_size,
                        *, tile_m=512, mxu_dtype=jnp.bfloat16):
    """x: (B, C, H, W) float32 NCHW.  Returns ((B, L, E) float32, (Hp, Wp)).

    `bias` is accepted for signature parity with the PyTorch module but is NOT
    used: training-mode BatchNorm centers each channel, and the channel mean
    contains the conv bias exactly, so it cancels out of the output.
    """
    del bias  # mathematically cancelled by BN centering

    B, C, H, W = x.shape
    p = patch_size
    assert H % p == 0 and W % p == 0
    Hp, Wp = H // p, W // p
    L = Hp * Wp
    E = weight.shape[0]
    K = C * p * p
    M = B * L

    # Lane-dense shapes (128-wide vreg lanes / MXU columns).
    K_pad = _round_up(K, 128)
    E_pad = _round_up(E, 128)
    tm = min(tile_m, _round_up(M, 8))
    M_pad = _round_up(M, tm)
    num_tiles = M_pad // tm

    # --- Wrapper-side layout plumbing (single fused XLA copy: patchify+pad+cast).
    # (B, C, Hp, p, Wp, p) -> (B, Hp, Wp, C, p, p) -> (M, K) -> pad -> bf16
    # TODO(synk): a BlockSpec straight over the NCHW input (block (1, C, p, W),
    # per-patch flatten in VMEM) would avoid this extra HBM roundtrip of x.
    xp = x.reshape(B, C, Hp, p, Wp, p)
    xp = jnp.transpose(xp, (0, 2, 4, 1, 3, 5)).reshape(M, K)
    xp = jnp.pad(xp, ((0, M_pad - M), (0, K_pad - K))).astype(mxu_dtype)

    # Conv weight (E, C, p, p) -> (K, E), padded, bf16 for the MXU.
    wmat = weight.reshape(E, K).T
    wmat = jnp.pad(wmat, ((0, K_pad - K), (0, E_pad - E))).astype(mxu_dtype)

    cparams = pltpu.CompilerParams(
        dimension_semantics=("parallel",),          # shard M tiles across TCs (v7x megacore)
        vmem_limit_bytes=_VMEM_LIMIT_BYTES,
    )

    # --- Pass 1: projection matmul + per-tile channel sum / sumsq partials.
    y_full, psum, psumsq = pl.pallas_call(
        _proj_stats_kernel,
        out_shape=(
            jax.ShapeDtypeStruct((M_pad, E_pad), jnp.float32),
            jax.ShapeDtypeStruct((num_tiles, 1, E_pad), jnp.float32),
            jax.ShapeDtypeStruct((num_tiles, 1, E_pad), jnp.float32),
        ),
        grid_spec=pltpu.PrefetchScalarGridSpec(
            num_scalar_prefetch=0,
            grid=(num_tiles,),
            in_specs=[
                pl.BlockSpec((tm, K_pad), lambda i: (i, 0)),
                pl.BlockSpec((K_pad, E_pad), lambda i: (0, 0)),   # weight stays resident
            ],
            out_specs=[
                pl.BlockSpec((tm, E_pad), lambda i: (i, 0)),
                pl.BlockSpec((1, 1, E_pad), lambda i: (i, 0, 0)),
                pl.BlockSpec((1, 1, E_pad), lambda i: (i, 0, 0)),
            ],
        ),
        compiler_params=cparams,
    )(xp, wmat)

    # --- Tiny finalize in plain XLA: (num_tiles, E_pad) reductions + BN fold.
    sum_c = jnp.sum(psum[:, 0, :], axis=0)         # (E_pad,)
    sumsq_c = jnp.sum(psumsq[:, 0, :], axis=0)     # (E_pad,)
    mean = sum_c / M                               # true token count (pad rows are zero)
    var = jnp.maximum(sumsq_c / M - mean * mean, 0.0)   # biased variance, clamp cancellation
    inv_std = jax.lax.rsqrt(var + BN_EPS)
    gamma_p = jnp.pad(gamma.astype(jnp.float32), (0, E_pad - E))
    beta_p = jnp.pad(beta.astype(jnp.float32), (0, E_pad - E))
    scale = (gamma_p * inv_std).reshape(1, E_pad)
    shift = (beta_p - mean * gamma_p * inv_std).reshape(1, E_pad)

    # --- Pass 2: elementwise normalize (lane-dense, parallel over M tiles).
    # TODO(synk): emit bf16 here if the downstream consumer accepts it (halves writeback).
    out_full = pl.pallas_call(
        _normalize_kernel,
        out_shape=jax.ShapeDtypeStruct((M_pad, E_pad), jnp.float32),
        grid_spec=pltpu.PrefetchScalarGridSpec(
            num_scalar_prefetch=0,
            grid=(num_tiles,),
            in_specs=[
                pl.BlockSpec((tm, E_pad), lambda i: (i, 0)),
                pl.BlockSpec((1, E_pad), lambda i: (0, 0)),
                pl.BlockSpec((1, E_pad), lambda i: (0, 0)),
            ],
            out_specs=pl.BlockSpec((tm, E_pad), lambda i: (i, 0)),
        ),
        compiler_params=cparams,
    )(y_full, scale, shift)

    out = out_full[:M, :E].reshape(B, L, E)
    return out, (Hp, Wp)


def reference_forward(x, weight, bias, gamma, beta, patch_size, conv_dtype=jnp.float32):
    """Pure-JAX reference mirroring the PyTorch forward (training-mode BN).

    conv_dtype lets us build a bf16-operand-matched reference (same MXU input
    rounding as the kernel) as well as the full-f32 semantic reference.
    """
    B, C, H, W = x.shape
    p = patch_size
    Hp, Wp = H // p, W // p
    y = jax.lax.conv_general_dilated(
        x.astype(conv_dtype), weight.astype(conv_dtype),
        window_strides=(p, p), padding="VALID",
        dimension_numbers=("NCHW", "OIHW", "NCHW"),
        preferred_element_type=jnp.float32,
    ) + bias.reshape(1, -1, 1, 1)                      # (B, E, Hp, Wp)
    y = y.reshape(B, -1, Hp * Wp)                      # (B, E, L)
    mean = jnp.mean(y, axis=(0, 2), keepdims=True)
    var = jnp.mean((y - mean) ** 2, axis=(0, 2), keepdims=True)   # biased
    y = (y - mean) / jnp.sqrt(var + BN_EPS)
    y = y * gamma.reshape(1, -1, 1) + beta.reshape(1, -1, 1)
    return jnp.transpose(y, (0, 2, 1)), (Hp, Wp)       # (B, L, E)


if __name__ == "__main__":
    # Small shapes consistent with the module: img=16, patch=4, in_chans=4, embed=32.
    B, C, IMG, P, EMB = 2, 4, 16, 4, 32

    key = jax.random.PRNGKey(0)
    kx, kw, kb = jax.random.split(key, 3)
    x = jax.random.normal(kx, (B, C, IMG, IMG), dtype=jnp.float32)

    # Conv2d weight/bias random (PyTorch-style bound); BN gamma=1, beta=0 defaults.
    fan_in = C * P * P
    bound = 1.0 / (fan_in ** 0.5)
    weight = jax.random.uniform(kw, (EMB, C, P, P), minval=-bound, maxval=bound,
                                dtype=jnp.float32)
    bias = jax.random.uniform(kb, (EMB,), minval=-bound, maxval=bound,
                              dtype=jnp.float32)
    gamma = jnp.ones((EMB,), jnp.float32)
    beta = jnp.zeros((EMB,), jnp.float32)

    out, (Hp, Wp) = patch_embed_forward(x, weight, bias, gamma, beta, P)
    out = jax.block_until_ready(out)

    assert out.shape == (B, Hp * Wp, EMB), out.shape
    assert (Hp, Wp) == (IMG // P, IMG // P)

    # Tight check vs. a reference with the same bf16 MXU-operand rounding
    # (also validates that dropping the conv bias is exact under training BN).
    ref_matched, _ = reference_forward(x, weight, bias, gamma, beta, P,
                                       conv_dtype=jnp.bfloat16)
    err_matched = float(jnp.max(jnp.abs(out - ref_matched)))
    assert err_matched < 1e-3, err_matched

    # Loose check vs. the full-f32 semantic reference (only bf16 input rounding differs).
    ref_f32, _ = reference_forward(x, weight, bias, gamma, beta, P,
                                   conv_dtype=jnp.float32)
    err_f32 = float(jnp.max(jnp.abs(out - ref_f32)))
    assert err_f32 < 5e-2, err_f32

    print("KERNEL_OK")
</pallas_src>

<mosaic_0001>
module attributes {stable_mosaic.version = 11 : i64} {
  func.func @_proj_stats_kernel(%arg0: i32, %arg1: memref<32x128xbf16, #tpu.memory_space<vmem>>, %arg2: memref<128x128xbf16, #tpu.memory_space<vmem>>, %arg3: memref<32x128xf32, #tpu.memory_space<vmem>>, %arg4: memref<1x1x128xf32, #tpu.memory_space<vmem>>, %arg5: memref<1x1x128xf32, #tpu.memory_space<vmem>>) attributes {dimension_semantics = [#tpu.dimension_semantics<parallel>], iteration_bounds = array<i64: 1>, scalar_prefetch = 0 : i64, scratch_operands = 0 : i64, tpu.core_type = #tpu.core_type<tc>, window_params = [{transform_indices = @transform_0, window_bounds = array<i64: 32, 128>}, {pipeline_mode = #tpu.pipeline_mode<synchronous>, transform_indices = @transform_1, window_bounds = array<i64: 128, 128>}, {transform_indices = @transform_2, window_bounds = array<i64: 32, 128>}, {transform_indices = @transform_3, window_bounds = array<i64: 1, 1, 128>}, {transform_indices = @transform_4, window_bounds = array<i64: 1, 1, 128>}]} {
    %c0 = arith.constant 0 : index
    %c0_0 = arith.constant 0 : index
    %0 = vector.load %arg1[%c0, %c0_0] : memref<32x128xbf16, #tpu.memory_space<vmem>>, vector<32x128xbf16>
    %c0_1 = arith.constant 0 : index
    %c0_2 = arith.constant 0 : index
    %1 = vector.load %arg2[%c0_1, %c0_2] : memref<128x128xbf16, #tpu.memory_space<vmem>>, vector<128x128xbf16>
    %cst = arith.constant dense<0.000000e+00> : vector<32x128xf32>
    %2 = tpu.matmul %0, %1, %cst {dimension_numbers = #tpu.dot_dimension_numbers<[1], [0], [0], [1], [0, 0, 1, 1], [], []>} : vector<32x128xbf16>, vector<128x128xbf16>, vector<32x128xf32> -> vector<32x128xf32>
    %c0_3 = arith.constant 0 : index
    %c0_4 = arith.constant 0 : index
    %3 = vector.load %arg3[%c0_3, %c0_4] : memref<32x128xf32, #tpu.memory_space<vmem>>, vector<32x128xf32>
    tpu.vector_store %arg3[%c0_3, %c0_4], %2 {strides = array<i32>} : memref<32x128xf32, #tpu.memory_space<vmem>>, vector<32x128xf32>,
    %cst_5 = arith.constant dense<0.000000e+00> : vector<128xf32>
    %4 = vector.multi_reduction <add>, %2, %cst_5 [0] : vector<32x128xf32> to vector<128xf32>
    %5 = vector.shape_cast %4 : vector<128xf32> to vector<1x128xf32>
    %6 = vector.shape_cast %5 : vector<1x128xf32> to vector<1x1x128xf32>
    %c0_6 = arith.constant 0 : index
    %c0_7 = arith.constant 0 : index
    %c0_8 = arith.constant 0 : index
    %7 = vector.load %arg4[%c0_6, %c0_7, %c0_8] : memref<1x1x128xf32, #tpu.memory_space<vmem>>, vector<1x1x128xf32>
    tpu.vector_store %arg4[%c0_6, %c0_7, %c0_8], %6 {strides = array<i32>} : memref<1x1x128xf32, #tpu.memory_space<vmem>>, vector<1x1x128xf32>,
    %8 = arith.mulf %2, %2 : vector<32x128xf32>
    %cst_9 = arith.constant dense<0.000000e+00> : vector<128xf32>
    %9 = vector.multi_reduction <add>, %8, %cst_9 [0] : vector<32x128xf32> to vector<128xf32>
    %10 = vector.shape_cast %9 : vector<128xf32> to vector<1x128xf32>
    %11 = vector.shape_cast %10 : vector<1x128xf32> to vector<1x1x128xf32>
    %c0_10 = arith.constant 0 : index
    %c0_11 = arith.constant 0 : index
    %c0_12 = arith.constant 0 : index
    %12 = vector.load %arg5[%c0_10, %c0_11, %c0_12] : memref<1x1x128xf32, #tpu.memory_space<vmem>>, vector<1x1x128xf32>
    tpu.vector_store %arg5[%c0_10, %c0_11, %c0_12], %11 {strides = array<i32>} : memref<1x1x128xf32, #tpu.memory_space<vmem>>, vector<1x1x128xf32>,
    return
  }
  func.func @transform_0(%arg0: i32) -> (i32, i32) {
    %c0_i32 = arith.constant 0 : i32
    %c0_i32_0 = arith.constant 0 : i32
    return %arg0, %c0_i32 : i32, i32
  }
  func.func @transform_1(%arg0: i32) -> (i32, i32) {
    %c0_i32 = arith.constant 0 : i32
    %c0_i32_0 = arith.constant 0 : i32
    %c0_i32_1 = arith.constant 0 : i32
    return %c0_i32, %c0_i32_0 : i32, i32
  }
  func.func @transform_2(%arg0: i32) -> (i32, i32) {
    %c0_i32 = arith.constant 0 : i32
    %c0_i32_0 = arith.constant 0 : i32
    return %arg0, %c0_i32 : i32, i32
  }
  func.func @transform_3(%arg0: i32) -> (i32, i32, i32) {
    %c0_i32 = arith.constant 0 : i32
    %c0_i32_0 = arith.constant 0 : i32
    %c0_i32_1 = arith.constant 0 : i32
    return %arg0, %c0_i32, %c0_i32_0 : i32, i32, i32
  }
  func.func @transform_4(%arg0: i32) -> (i32, i32, i32) {
    %c0_i32 = arith.constant 0 : i32
    %c0_i32_0 = arith.constant 0 : i32
    %c0_i32_1 = arith.constant 0 : i32
    return %arg0, %c0_i32, %c0_i32_0 : i32, i32, i32
  }
}

</mosaic_0001>

<bundles_post_ra>
// kernel: tpu_custom_call.1
= control target key start
LH: loop header
LB: loop body
LE: loop exit
PB: predicated region body
PF: predicated region fallthrough
CT: control target
= control target key end

     0   :  { %10 = vsyncpa [#allocation3], 0  ;;  %s526_s0 = inlined_call_operand.hbm [shape: bf16[32,128], index: 0, kind: input, shape index: {}]   ;;  %s527_s1 = inlined_call_operand.hbm [shape: bf16[128,128], index: 1, kind: input, shape index: {}]   ;;  %s528_s2 = inlined_call_operand.hbm [shape: f32[32,128], index: 2, kind: output, shape index: {0}]   ;;  %s529_s3 = inlined_call_operand.hbm [shape: f32[1,1,128], index: 3, kind: output, shape index: {1}]   ;;  %s530_s4 = inlined_call_operand.hbm [shape: f32[1,1,128], index: 4, kind: output, shape index: {2}]  }
   0x1   :  { %11 = vsyncpa [#allocation6], 0 }
   0x2   :  { %12 = vsyncpa [#allocation4], 0 }
   0x3   :  { %13 = vsyncpa [#allocation9], 0  ;;  %s424_s15 = smov [#allocation2]   ;;  %s306_s19 = scalar_lea.hbm %s526_s0, 256 }
   0x4   :  { %s19_s16 = sshll.u32 %s424_s15, 4  ;;  %p307_p0 = scmp.ne.s32.totalorder %s526_s0, %s306_s19  ;;  %s20_s16 = int_to_ptr.vmem [resolvable:$true] %s19_s16 }
   0x5   :  { %p310_p1 = scmp.lt.u32.totalorder %s306_s19, %s526_s0 }
   0x7   :  { %p312_p2 = pnand %p310_p1, %p307_p0 }
   0x9   :  { %315 = shalt.err (!%p312_p2)
}
   0xa   :  { %s316_s24 = scalar_lea.vmem %s20_s16, 256  ;;  %p321_p4 = scmp.lt.s32.totalorder %s20_s16, %s20_s16 }
   0xb   :  { %p317_p3 = scmp.ne.s32.totalorder %s20_s16, %s316_s24  ;;  %p322_p5 = scmp.lt.s32.totalorder %s316_s24, %s316_s24 }
   0xd   :  { %p323_p6 = por %p322_p5, %p321_p4 }
   0xf   :  { %p324_p7 = pnand %p323_p6, %p317_p3 }
  0x11   :  { %327 = shalt.err (!%p324_p7)
}
  0x12   :  { %s425_s25 = smov 64   ;;  %s426_s26 = smov 4  }
  0x13   :  { %25 = dma.hbm_to_vmem [thread:$0]  %s526_s0, 256, %s20_s16, [#allocation3], %s425_s25, %s425_s25, %s426_s26  }
  0x14   :  { %s427_s29 = smov [#allocation5]   ;;  %s328_s7 = scalar_lea.hbm %s527_s1, 1024 }
  0x15   :  { %s31_s30 = sshll.u32 %s427_s29, 4  ;;  %p329_p8 = scmp.ne.s32.totalorder %s527_s1, %s328_s7  ;;  %s32_s30 = int_to_ptr.vmem [resolvable:$true] %s31_s30 }
  0x16   :  { %p332_p9 = scmp.lt.u32.totalorder %s328_s7, %s527_s1 }
  0x18   :  { %p334_p10 = pnand %p332_p9, %p329_p8 }
  0x1a   :  { %337 = shalt.err (!%p334_p10)
}
  0x1b   :  { %s338_s12 = scalar_lea.vmem %s32_s30, 1024  ;;  %p343_p12 = scmp.lt.s32.totalorder %s32_s30, %s32_s30 }
  0x1c   :  { %p339_p11 = scmp.ne.s32.totalorder %s32_s30, %s338_s12  ;;  %p344_p13 = scmp.lt.s32.totalorder %s338_s12, %s338_s12 }
  0x1e   :  { %p345_p0 = por %p344_p13, %p343_p12 }
  0x20   :  { %p346_p1 = pnand %p345_p0, %p339_p11 }
  0x22   :  { %349 = shalt.err (!%p346_p1)
}
  0x23   :  { %37 = dma.hbm_to_vmem [thread:$0]  %s527_s1, 1024, %s32_s30, [#allocation6], %s425_s25, %s425_s25, %s426_s26  }
  0x24   :  { %416 = dma.done.wait [#allocation3], 256  }
  0x25   :  { %417 = vsyncadd [#allocation3], 4294967040 }
  0x26   :  { %418 = dma.done.wait [#allocation6], 1024  }
  0x27   :  { %419 = vsyncadd [#allocation6], 4294966272  ;;  %v296_v0 = vld [vmem:[#allocation5] sm:$0xff]   ;;  %v297_v1 = vld [vmem:[#allocation5 + $0x8] sm:$0xff]   ;;  %s428_s1 = smov [#allocation7]  }
  0x28   :  { %267 = vmatprep.subr.bf16.mxu0 %v296_v0  ;;  %v298_v2 = vld [vmem:[#allocation5 + $0x10] sm:$0xff]   ;;  %v299_v3 = vld [vmem:[#allocation5 + $0x18] sm:$0xff]   ;;  %v300_v5 = vld [vmem:[#allocation5 + $0x20] sm:$0xff]   ;;  %s207_s14 = sshll.u32 %s428_s1, 4  ;;  %s208_s14 = int_to_ptr.vmem [resolvable:$true] %s207_s14 }
  0x29   :  { %268 = vmatpush3.bf16.msra.mxu0 %v296_v0  ;;  %v304_v4 = vld [vmem:[#allocation2] sm:$0xff]   ;;  %v301_v6 = vld [vmem:[#allocation5 + $0x28] sm:$0xff]   ;;  %v303_v8 = vld [vmem:[#allocation5 + $0x38] sm:$0xff]   ;;  %s350_s15 = scalar_lea.vmem %s208_s14, 512  ;;  %p355_p3 = scmp.lt.s32.totalorder %s208_s14, %s208_s14 }
  0x2a   :  { %269 = vmatprep.subr.bf16.mxu0 %v297_v1  ;;  %283 = vmatprep.mubr.bf16.mxu0 %v304_v4  ;;  %v302_v7 = vld [vmem:[#allocation5 + $0x30] sm:$0xff]   ;;  %v305_v9 = vld [vmem:[#allocation2 + $0x8] sm:$0xff]   ;;  %p351_p2 = scmp.ne.s32.totalorder %s208_s14, %s350_s15  ;;  %p356_p4 = scmp.lt.s32.totalorder %s350_s15, %s350_s15 }
  0x2c   :  { %p357_p5 = por %p356_p4, %p355_p3 }
  0x2d   :  { %270 = vmatpush3.bf16.msra.mxu0 %v297_v1 }
  0x2e   :  { %271 = vmatprep.subr.bf16.mxu0 %v298_v2  ;;  %p358_p6 = pnand %p357_p5, %p351_p2 }
  0x31   :  { %272 = vmatpush3.bf16.msra.mxu0 %v298_v2 }
  0x32   :  { %273 = vmatprep.subr.bf16.mxu0 %v299_v3 }
  0x35   :  { %274 = vmatpush3.bf16.msra.mxu0 %v299_v3 }
  0x36   :  { %275 = vmatprep.subr.bf16.mxu0 %v300_v5 }
  0x39   :  { %276 = vmatpush3.bf16.msra.mxu0 %v300_v5 }
  0x3a   :  { %277 = vmatprep.subr.bf16.mxu0 %v301_v6 }
  0x3d   :  { %278 = vmatpush3.bf16.msra.mxu0 %v301_v6 }
  0x3e   :  { %279 = vmatprep.subr.bf16.mxu0 %v302_v7 }
  0x41   :  { %280 = vmatpush3.bf16.msra.mxu0 %v302_v7 }
  0x42   :  { %281 = vmatprep.subr.bf16.mxu0 %v303_v8 }
  0x45   :  { %282 = vmatpush3.bf16.msra.mxu0 %v303_v8 }
  0x48   :  { %284 = vmatmul.mubr.bf16.vlgmr.msra.gmra.mrb[0].mxu0 %v305_v9 }
 0x11b   :  { %v285_v10 = vpop.f32.mrb[0].mxu0 }
 0x11c   :  { %176 = vst [vmem:[#allocation7 + $0x10] sm:$0xff] %v285_v10  ;;  %v159_v11 = vpop.f32.mrb[1].mxu0 }
 0x11d   :  { %174 = vst [vmem:[#allocation7] sm:$0xff] %v159_v11  ;;  %v286_v12 = vpop.f32.mrb[2].mxu0  ;;  %v188_v14 = vmul.f32 %v159_v11, %v159_v11 }
 0x11e   :  { %177 = vst [vmem:[#allocation7 + $0x18] sm:$0xff] %v286_v12  ;;  %v162_v13 = vpop.f32.mrb[3].mxu0 }
 0x11f   :  { %175 = vst [vmem:[#allocation7 + $0x8] sm:$0xff] %v162_v13  ;;  %v178_v15 = vadd.f32 %v162_v13, %v159_v11  ;;  %v189_v16 = vmul.f32 %v162_v13, %v162_v13 }
 0x120   :  { %361 = shalt.err (!%p358_p6)
}
 0x121   :  { %s362_s18 = scalar_lea.hbm %s528_s2, 512 }
 0x122   :  { %p363_p7 = scmp.ne.s32.totalorder %s528_s2, %s362_s18  ;;  %p366_p8 = scmp.lt.u32.totalorder %s362_s18, %s528_s2 }
 0x124   :  { %p368_p9 = pnand %p366_p8, %p363_p7 }
 0x126   :  { %371 = shalt.err (!%p368_p9)
}
 0x127   :  { %s429_s23 = smov 128   ;;  %s430_s24 = smov 8   ;;  %v190_v17 = vmul.f32 %v285_v10, %v285_v10  ;;  %v179_v18 = vadd.f32 %v285_v10, %v178_v15  ;;  %v192_v19 = vadd.f32 %v189_v16, %v188_v14  ;;  %v191_v20 = vmul.f32 %v286_v12, %v286_v12 }
 0x128   :  { %213 = dma.vmem_to_hbm [thread:$0]  %s208_s14, 512, %s528_s2, [#allocation4], %s429_s23, %s429_s23, %s430_s24  }
 0x129   :  { %v180_v21 = vadd.f32 %v286_v12, %v179_v18  ;;  %v193_v22 = vadd.f32 %v192_v19, %v190_v17  ;;  %s431_s27 = smov [#allocation8]   ;;  %s432_s29 = smov [#allocation10]  }
 0x12a   :  { %s220_s28 = sshll.u32 %s431_s27, 4  ;;  %s230_s2 = sshll.u32 %s432_s29, 4  ;;  %s221_s28 = int_to_ptr.vmem [resolvable:$true] %s220_s28  ;;  %s494_s2 = int_to_ptr.vmem [resolvable:$true] %s230_s2 }
 0x12b   :  { %v181_v23 = vrot.slane %v180_v21, 4  ;;  %v194_v24 = vadd.f32 %v193_v22, %v191_v20  ;;  %s372_s30 = scalar_lea.vmem %s221_s28, 16  ;;  %s376_s5 = scalar_lea.vmem %s221_s28, 32 }
 0x12c   :  { %p373_p10 = scmp.ne.s32.totalorder %s221_s28, %s372_s30  ;;  %p377_p11 = scmp.lt.s32.totalorder %s221_s28, %s221_s28 }
 0x12d   :  { %v195_v25 = vrot.slane %v194_v24, 4  ;;  %v182_v26 = vadd.f32 %v181_v23, %v180_v21  ;;  %p378_p12 = scmp.lt.s32.totalorder %s376_s5, %s372_s30 }
 0x12f   :  { %v183_v27 = vrot.slane %v182_v26, 2  ;;  %v196_v28 = vadd.f32 %v195_v25, %v194_v24  ;;  %p379_p13 = por %p378_p12, %p377_p11 }
 0x131   :  { %v184_v29 = vadd.f32 %v183_v27, %v182_v26  ;;  %v197_v30 = vrot.slane %v196_v28, 2  ;;  %p380_p0 = pnand %p379_p13, %p373_p10 }
 0x133   :  { %v185_v31 = vrot.slane %v184_v29, 1  ;;  %v198_v32 = vadd.f32 %v197_v30, %v196_v28 }
 0x135   :  { %v186_v33 = vadd.f32 %v185_v31, %v184_v29  ;;  %v199_v34 = vrot.slane %v198_v32, 1 }
 0x137   :  { %187 = vst [vmem:[#allocation8] sm:$0x1] %v186_v33  ;;  %v200_v35 = vadd.f32 %v199_v34, %v198_v32 }
 0x138   :  { %383 = shalt.err (!%p380_p0)
}
 0x139   :  { %s384_s8 = scalar_lea.hbm %s529_s3, 16 }
 0x13a   :  { %p385_p1 = scmp.ne.s32.totalorder %s529_s3, %s384_s8  ;;  %p388_p2 = scmp.lt.u32.totalorder %s384_s8, %s529_s3 }
 0x13c   :  { %p390_p3 = pnand %p388_p2, %p385_p1 }
 0x13e   :  { %393 = shalt.err (!%p390_p3)
}
 0x13f   :  { %223 = dma.vmem_to_hbm [thread:$0]  %s221_s28, 16, %s529_s3, [#allocation9]   ;;  %201 = vst [vmem:[#allocation10] sm:$0x1] %v200_v35 }
 0x140   :  { %s394_s1 = scalar_lea.vmem %s494_s2, 16  ;;  %s398_s14 = scalar_lea.vmem %s494_s2, 32 }
 0x141   :  { %p395_p4 = scmp.ne.s32.totalorder %s494_s2, %s394_s1  ;;  %p399_p5 = scmp.lt.s32.totalorder %s494_s2, %s494_s2 }
 0x142   :  { %p400_p6 = scmp.lt.s32.totalorder %s398_s14, %s394_s1 }
 0x144   :  { %p401_p7 = por %p400_p6, %p399_p5 }
 0x146   :  { %p402_p8 = pnand %p401_p7, %p395_p4 }
 0x148   :  { %405 = shalt.err (!%p402_p8)
}
 0x149   :  { %s406_s17 = scalar_lea.hbm %s530_s4, 16 }
 0x14a   :  { %p407_p9 = scmp.ne.s32.totalorder %s530_s4, %s406_s17  ;;  %p410_p10 = scmp.lt.u32.totalorder %s406_s17, %s530_s4 }
 0x14c   :  { %p412_p11 = pnand %p410_p10, %p407_p9 }
 0x14e   :  { %415 = shalt.err (!%p412_p11)
}
 0x14f   :  { %233 = dma.vmem_to_hbm [thread:$0]  %s494_s2, 16, %s530_s4, [#allocation9]  }
 0x150   :  { %420 = dma.done.wait [#allocation4], 512  }
 0x151   :  { %421 = vsyncadd [#allocation4], 4294966784 }
 0x152   :  { %422 = dma.done.wait [#allocation9], 32  }
 0x153   :  { %423 = vsyncadd [#allocation9], 4294967264 }
 0x154   :  { %243 = vsyncpa [#allocation3], 1 }
 0x155   :  { %244 = vsyncpa [#allocation6], 1 }
 0x156   :  { %245 = vsyncpa [#allocation4], 1 }
 0x157   :  { %246 = vsyncpa [#allocation9], 1 }

</bundles_post_ra>
